<compile_context>
chip_gen: v7x
topology: tpu7x:2x2x1
jax: 0.10.0
libtpu: 0.0.40
codegen_flags: <defaults>
</compile_context>

<pallas_src>
import jax
import jax.numpy as jnp
from jax.experimental import pallas as pl
from jax.experimental.pallas import tpu as pltpu

_MiB = 1024 * 1024


def _round_up(x: int, m: int) -> int:
    return (x + m - 1) // m * m


def _tpu_defaults():
    """Per-generation tile targets and VMEM budget (double-buffered footprint)."""
    kind = ""
    try:
        kind = jax.devices()[0].device_kind.lower()
    except Exception:
        pass
    if "v5" in kind:
        # v5e: 197 TF/s MXU vs ~820 GB/s HBM -> ~512-768 tiles already saturate.
        return dict(tm=512, tn=768, budget=64 * _MiB, two_core=False)
    if "v6" in kind:
        # v6e: 128 MiB physical VMEM; let tiles grow toward the 918 TF/s roofline.
        return dict(tm=1024, tn=2048, budget=96 * _MiB, two_core=False)
    if "7" in kind:
        # v7x: only 64 MiB physical VMEM per TC, 2 TensorCores per chip.
        return dict(tm=1024, tn=2048, budget=48 * _MiB, two_core=True)
    # Unknown part: conservative budget that fits every generation.
    return dict(tm=1024, tn=1024, budget=48 * _MiB, two_core=False)


def _footprint(tm: int, tn: int, tk: int) -> int:
    """Double-buffered VMEM bytes: bf16 acts + bf16 weight + f32 out + bias."""
    return (2 * tm * tk * 2) + (2 * tn * tk * 2) + (2 * tm * tn * 4) + (2 * tn * 4)


def _choose_tiles(n: int, v: int, d: int, cfg):
    d_p = _round_up(d, 128)
    v_p = _round_up(v, 128)
    n_p8 = _round_up(n, 8)

    tm = min(cfg["tm"], n_p8)          # sublane dim: multiple of 8
    tn = min(cfg["tn"], v_p)           # lane dim: multiple of 128

    # Collapse the reduction axis when padded D fits comfortably in VMEM.
    if d_p <= 4096:
        tk = d_p
    else:
        tk = 2048 if d_p % 2048 == 0 else 1024

    # Shrink until the double-buffered footprint fits the per-generation
    # budget.  Prefer shrinking tk (doesn't hurt tm*tn/(tm+tn) intensity),
    # then tm, then tn (keep the output tile wide and lane-dense).
    while _footprint(tm, tn, tk) > cfg["budget"]:
        if tk >= 1024 and (tk // 2) % 128 == 0:
            tk //= 2
        elif tm > 256 and (tm // 2) % 8 == 0:
            tm //= 2
        elif tn > 512 and (tn // 2) % 128 == 0:
            tn //= 2
        else:
            break

    # Snap tn to a divisor of the 128-aligned vocab when one exists nearby so
    # the weight pad along V never fires for aligned vocabularies.
    if v_p % tn != 0:
        lo = max(512, tn // 2)
        for cand in range(tn - 128, lo - 1, -128):
            if cand % 128 == 0 and v_p % cand == 0:
                tn = cand
                break

    # v7x: if the i axis has a single block, make sure the j axis has >= 2
    # blocks so both TensorCores get work on the dominant matmul.
    if cfg["two_core"] and n_p8 <= tm and v_p // tn < 2 and tn >= 256 \
            and (tn // 2) % 128 == 0:
        tn //= 2

    return tm, tn, tk


def _lm_kernel_single(x_ref, w_ref, b_ref, o_ref):
    """Whole-D contraction: one (tm, tn) logits tile per grid step."""
    acc = jax.lax.dot_general(
        x_ref[...], w_ref[...],
        dimension_numbers=(((1,), (1,)), ((), ())),   # contract D of both
        preferred_element_type=jnp.float32)
    o_ref[...] = (acc + b_ref[...]).astype(o_ref.dtype)


def _lm_kernel_kloop_inplace(x_ref, w_ref, b_ref, o_ref):
    """k-reduction accumulating directly into the f32 output tile (no scratch)."""
    k = pl.program_id(2)

    @pl.when(k == 0)
    def _():
        o_ref[...] = jnp.zeros_like(o_ref)

    o_ref[...] += jax.lax.dot_general(
        x_ref[...], w_ref[...],
        dimension_numbers=(((1,), (1,)), ((), ())),
        preferred_element_type=jnp.float32)

    @pl.when(k == pl.num_programs(2) - 1)
    def _():
        o_ref[...] += b_ref[...]


def _lm_kernel_kloop_scratch(x_ref, w_ref, b_ref, o_ref, acc_ref):
    """k-reduction with f32 scratch; used only for non-f32 logits with a k axis."""
    k = pl.program_id(2)

    @pl.when(k == 0)
    def _():
        acc_ref[...] = jnp.zeros_like(acc_ref)

    acc_ref[...] += jax.lax.dot_general(
        x_ref[...], w_ref[...],
        dimension_numbers=(((1,), (1,)), ((), ())),
        preferred_element_type=jnp.float32)

    @pl.when(k == pl.num_programs(2) - 1)
    def _():
        o_ref[...] = (acc_ref[...] + b_ref[...]).astype(o_ref.dtype)


def language_model_forward(x_ids, embed_table, fc_weight, fc_bias,
                           *, out_dtype=jnp.float32, tiles=None):
    """x_ids: (B, S) int; embed_table: (V, D); fc_weight: (V, D) PyTorch layout;
    fc_bias: (V,).  Returns (B, S, V) logits in out_dtype (default f32)."""
    b, s = x_ids.shape
    v, d = embed_table.shape
    n = b * s
    out_dtype = jnp.dtype(out_dtype)

    cfg = _tpu_defaults()
    tm, tn, tk = _choose_tiles(n, v, d, cfg) if tiles is None else tiles

    n_p = _round_up(n, tm)
    v_p = _round_up(v, tn)
    d_p = _round_up(d, tk)

    # Weights should arrive pre-cast to bf16 (stored once); cast only if not.
    emb = embed_table if embed_table.dtype == jnp.bfloat16 \
        else embed_table.astype(jnp.bfloat16)
    w = fc_weight if fc_weight.dtype == jnp.bfloat16 \
        else fc_weight.astype(jnp.bfloat16)

    # Fused gather + cast + pad on activations: pad ids (with 0) to n_p, then a
    # single gather from the bf16 table emits the (n_p, D) bf16 slab directly.
    # TODO(synk): an in-kernel gather of tm arbitrary rows needs per-row manual
    # DMA (scalar-prefetched ids); wrapper-side jnp.take is used instead.
    ids = x_ids.reshape(n).astype(jnp.int32)
    if n_p != n:
        ids = jnp.pad(ids, (0, n_p - n))
    acts = jnp.take(emb, ids, axis=0)                      # (n_p, d) bf16
    if d_p != d:
        acts = jnp.pad(acts, ((0, 0), (0, d_p - d)))

    # Pad the weight / bias only when shapes are not already tile-aligned.
    if (v_p, d_p) != (v, d):
        w = jnp.pad(w, ((0, v_p - v), (0, d_p - d)))
    bias = fc_bias.astype(jnp.float32).reshape(1, v)
    if v_p != v:
        bias = jnp.pad(bias, ((0, 0), (0, v_p - v)))

    gi, gj, gk = n_p // tm, v_p // tn, d_p // tk

    if gk == 1:
        # No reduction axis: single dot + bias + store per (i, j).
        kernel = _lm_kernel_single
        grid = (gi, gj)
        in_specs = [
            pl.BlockSpec((tm, tk), lambda i, j: (i, 0)),   # activations (N, D)
            pl.BlockSpec((tn, tk), lambda i, j: (j, 0)),   # weight (V, D) layout
            pl.BlockSpec((1, tn), lambda i, j: (0, j)),    # bias
        ]
        out_specs = pl.BlockSpec((tm, tn), lambda i, j: (i, j))
        scratch = []
        dims = ("parallel", "parallel")
    else:
        grid = (gi, gj, gk)
        in_specs = [
            pl.BlockSpec((tm, tk), lambda i, j, k: (i, k)),
            pl.BlockSpec((tn, tk), lambda i, j, k: (j, k)),
            pl.BlockSpec((1, tn), lambda i, j, k: (0, j)),
        ]
        out_specs = pl.BlockSpec((tm, tn), lambda i, j, k: (i, j))
        dims = ("parallel", "parallel", "arbitrary")
        if out_dtype == jnp.float32:
            # Accumulate straight into the resident f32 output tile.
            kernel = _lm_kernel_kloop_inplace
            scratch = []
        else:
            kernel = _lm_kernel_kloop_scratch
            scratch = [pltpu.VMEM((tm, tn), jnp.float32)]

    out = pl.pallas_call(
        kernel,
        out_shape=jax.ShapeDtypeStruct((n_p, v_p), out_dtype),
        grid_spec=pltpu.PrefetchScalarGridSpec(
            num_scalar_prefetch=0,
            grid=grid,
            in_specs=in_specs,
            out_specs=out_specs,
            scratch_shapes=scratch,
        ),
        compiler_params=pltpu.CompilerParams(
            dimension_semantics=dims,
            vmem_limit_bytes=cfg["budget"],
        ),
    )(acts, w, bias)

    return out[:n, :v].reshape(b, s, v)


if __name__ == "__main__":
    # Small shapes consistent with the module's forward.
    batch, seq = 2, 8
    vocab_size, embedding_dim = 32, 32

    key = jax.random.PRNGKey(0)
    k_ids, k_emb, k_w, k_b = jax.random.split(key, 4)

    x = jax.random.randint(k_ids, (batch, seq), 0, vocab_size, dtype=jnp.int32)
    embed_table = jax.random.normal(k_emb, (vocab_size, embedding_dim),
                                    dtype=jnp.float32) * 0.02
    fc_weight = jax.random.normal(k_w, (vocab_size, embedding_dim),
                                  dtype=jnp.float32) * 0.02
    fc_bias = jax.random.normal(k_b, (vocab_size,), dtype=jnp.float32) * 0.02

    # Pass weights pre-cast to bf16 so the kernel path does no per-call
    # full-table casts (perf review item).
    embed_bf16 = embed_table.astype(jnp.bfloat16)
    weight_bf16 = fc_weight.astype(jnp.bfloat16)

    out = language_model_forward(x, embed_bf16, weight_bf16, fc_bias)
    out = jax.block_until_ready(out)

    # Reference with the same bf16 MXU inputs / f32 accumulation dtype path.
    emb_f = embed_bf16.astype(jnp.float32)
    w_f = weight_bf16.astype(jnp.float32)
    ref = emb_f[x] @ w_f.T + fc_bias

    assert out.shape == (batch, seq, vocab_size)
    assert out.dtype == jnp.float32
    assert jnp.allclose(out, ref, atol=1e-5, rtol=1e-5), \
        float(jnp.max(jnp.abs(out - ref)))

    print("KERNEL_OK")
</pallas_src>

<mosaic_0001>
module attributes {stable_mosaic.version = 11 : i64} {
  func.func @_lm_kernel_single(%arg0: i32, %arg1: i32, %arg2: memref<16x128xbf16, #tpu.memory_space<vmem>>, %arg3: memref<128x128xbf16, #tpu.memory_space<vmem>>, %arg4: memref<1x128xf32, #tpu.memory_space<vmem>>, %arg5: memref<16x128xf32, #tpu.memory_space<vmem>>) attributes {dimension_semantics = [#tpu.dimension_semantics<parallel>, #tpu.dimension_semantics<parallel>], iteration_bounds = array<i64: 1, 1>, scalar_prefetch = 0 : i64, scratch_operands = 0 : i64, tpu.core_type = #tpu.core_type<tc>, window_params = [{transform_indices = @transform_0, window_bounds = array<i64: 16, 128>}, {transform_indices = @transform_1, window_bounds = array<i64: 128, 128>}, {transform_indices = @transform_2, window_bounds = array<i64: 1, 128>}, {transform_indices = @transform_3, window_bounds = array<i64: 16, 128>}]} {
    %c0 = arith.constant 0 : index
    %c0_0 = arith.constant 0 : index
    %0 = vector.load %arg2[%c0, %c0_0] : memref<16x128xbf16, #tpu.memory_space<vmem>>, vector<16x128xbf16>
    %c0_1 = arith.constant 0 : index
    %c0_2 = arith.constant 0 : index
    %1 = vector.load %arg3[%c0_1, %c0_2] : memref<128x128xbf16, #tpu.memory_space<vmem>>, vector<128x128xbf16>
    %cst = arith.constant dense<0.000000e+00> : vector<16x128xf32>
    %2 = tpu.matmul %0, %1, %cst {dimension_numbers = #tpu.dot_dimension_numbers<[1], [1], [0], [0], [0, 0, 1, 0], [], []>} : vector<16x128xbf16>, vector<128x128xbf16>, vector<16x128xf32> -> vector<16x128xf32>
    %c0_3 = arith.constant 0 : index
    %c0_4 = arith.constant 0 : index
    %3 = vector.load %arg4[%c0_3, %c0_4] : memref<1x128xf32, #tpu.memory_space<vmem>>, vector<1x128xf32>
    %4 = vector.broadcast %3 : vector<1x128xf32> to vector<16x128xf32>
    %5 = arith.addf %2, %4 : vector<16x128xf32>
    %c0_5 = arith.constant 0 : index
    %c0_6 = arith.constant 0 : index
    %6 = vector.load %arg5[%c0_5, %c0_6] : memref<16x128xf32, #tpu.memory_space<vmem>>, vector<16x128xf32>
    tpu.vector_store %arg5[%c0_5, %c0_6], %5 {strides = array<i32>} : memref<16x128xf32, #tpu.memory_space<vmem>>, vector<16x128xf32>,
    return
  }
  func.func @transform_0(%arg0: i32, %arg1: i32) -> (i32, i32) {
    %c0_i32 = arith.constant 0 : i32
    %c0_i32_0 = arith.constant 0 : i32
    return %arg0, %c0_i32 : i32, i32
  }
  func.func @transform_1(%arg0: i32, %arg1: i32) -> (i32, i32) {
    %c0_i32 = arith.constant 0 : i32
    %c0_i32_0 = arith.constant 0 : i32
    return %arg1, %c0_i32 : i32, i32
  }
  func.func @transform_2(%arg0: i32, %arg1: i32) -> (i32, i32) {
    %c0_i32 = arith.constant 0 : i32
    %c0_i32_0 = arith.constant 0 : i32
    return %c0_i32, %arg1 : i32, i32
  }
  func.func @transform_3(%arg0: i32, %arg1: i32) -> (i32, i32) {
    %c0_i32 = arith.constant 0 : i32
    return %arg0, %arg1 : i32, i32
  }
}

</mosaic_0001>

<bundles_post_ra>
// kernel: tpu_custom_call.1
= control target key start
LH: loop header
LB: loop body
LE: loop exit
PB: predicated region body
PF: predicated region fallthrough
CT: control target
= control target key end

     0   :  { %8 = vsyncpa [#allocation3], 0  ;;  %s381_s0 = inlined_call_operand.hbm [shape: bf16[16,128], index: 0, kind: input, shape index: {}]   ;;  %s382_s1 = inlined_call_operand.hbm [shape: bf16[128,128], index: 1, kind: input, shape index: {}]   ;;  %s383_s2 = inlined_call_operand.vmem [shape: f32[1,128], index: 2, kind: input, shape index: {}]   ;;  %s384_s3 = inlined_call_operand.hbm [shape: f32[16,128], index: 3, kind: output, shape index: {}]  }
   0x1   :  { %9 = vsyncpa [#allocation6], 0 }
   0x2   :  { %10 = vsyncpa [#allocation4], 0  ;;  %s313_s12 = smov [#allocation2]   ;;  %s241_s16 = scalar_lea.hbm %s381_s0, 128 }
   0x3   :  { %s16_s13 = sshll.u32 %s313_s12, 4  ;;  %p242_p0 = scmp.ne.s32.totalorder %s381_s0, %s241_s16  ;;  %s17_s13 = int_to_ptr.vmem [resolvable:$true] %s16_s13 }
   0x4   :  { %p245_p1 = scmp.lt.u32.totalorder %s241_s16, %s381_s0 }
   0x6   :  { %p247_p2 = pnand %p245_p1, %p242_p0 }
   0x8   :  { %250 = shalt.err (!%p247_p2)
}
   0x9   :  { %s251_s21 = scalar_lea.vmem %s17_s13, 128  ;;  %p256_p4 = scmp.lt.s32.totalorder %s17_s13, %s17_s13 }
   0xa   :  { %p252_p3 = scmp.ne.s32.totalorder %s17_s13, %s251_s21  ;;  %p257_p5 = scmp.lt.s32.totalorder %s251_s21, %s251_s21 }
   0xc   :  { %p258_p6 = por %p257_p5, %p256_p4 }
   0xe   :  { %p259_p7 = pnand %p258_p6, %p252_p3 }
  0x10   :  { %262 = shalt.err (!%p259_p7)
}
  0x11   :  { %s314_s22 = smov 64   ;;  %s315_s23 = smov 4  }
  0x12   :  { %22 = dma.hbm_to_vmem [thread:$0]  %s381_s0, 128, %s17_s13, [#allocation3], %s314_s22, %s314_s22, %s315_s23  }
  0x13   :  { %s316_s26 = smov [#allocation5]   ;;  %s263_s30 = scalar_lea.hbm %s382_s1, 1024 }
  0x14   :  { %s28_s27 = sshll.u32 %s316_s26, 4  ;;  %p264_p8 = scmp.ne.s32.totalorder %s382_s1, %s263_s30  ;;  %s29_s27 = int_to_ptr.vmem [resolvable:$true] %s28_s27 }
  0x15   :  { %p267_p9 = scmp.lt.u32.totalorder %s263_s30, %s382_s1 }
  0x17   :  { %p269_p10 = pnand %p267_p9, %p264_p8 }
  0x19   :  { %272 = shalt.err (!%p269_p10)
}
  0x1a   :  { %s273_s8 = scalar_lea.vmem %s29_s27, 1024  ;;  %p278_p12 = scmp.lt.s32.totalorder %s29_s27, %s29_s27 }
  0x1b   :  { %p274_p11 = scmp.ne.s32.totalorder %s29_s27, %s273_s8  ;;  %p279_p13 = scmp.lt.s32.totalorder %s273_s8, %s273_s8 }
  0x1d   :  { %p280_p0 = por %p279_p13, %p278_p12 }
  0x1f   :  { %p281_p1 = pnand %p280_p0, %p274_p11 }
  0x21   :  { %284 = shalt.err (!%p281_p1)
}
  0x22   :  { %34 = dma.hbm_to_vmem [thread:$0]  %s382_s1, 1024, %s29_s27, [#allocation6], %s314_s22, %s314_s22, %s315_s23  }
  0x23   :  { %307 = dma.done.wait [#allocation3], 128  }
  0x24   :  { %308 = vsyncadd [#allocation3], 4294967168 }
  0x25   :  { %309 = dma.done.wait [#allocation6], 1024  }
  0x26   :  { %310 = vsyncadd [#allocation6], 4294966272  ;;  %v317_v0 = vmov 0.0   ;;  %vm318_vm0 = vmmov 0   ;;  %v232_v1 = vld [vmem:[#allocation5] sm:$0xff]   ;;  %v233_v2 = vld [vmem:[#allocation5 + $0x8] sm:$0xff]  }
  0x27   :  { %203 = vmatprep.subr.bf16.mxu0 %v317_v0  ;;  %219 = vmatprep.mubr.msk.bf16.mxu0 %vm318_vm0, %v317_v0  ;;  %v234_v3 = vld [vmem:[#allocation5 + $0x10] sm:$0xff]   ;;  %v235_v4 = vld [vmem:[#allocation5 + $0x18] sm:$0xff]   ;;  %v236_v5 = vld [vmem:[#allocation5 + $0x20] sm:$0xff]   ;;  %s319_s11 = smov [#allocation7]  }
  0x28   :  { %204 = vmatpush3.bf16.xpose.msra.mxu0 %v232_v1  ;;  %v237_v6 = vld [vmem:[#allocation5 + $0x28] sm:$0xff]   ;;  %v238_v7 = vld [vmem:[#allocation5 + $0x30] sm:$0xff]   ;;  %v239_v8 = vld [vmem:[#allocation5 + $0x38] sm:$0xff]   ;;  %s171_s12 = sshll.u32 %s319_s11, 4  ;;  %s172_s12 = int_to_ptr.vmem [resolvable:$true] %s171_s12 }
  0x29   :  { %205 = vmatprep.subr.bf16.mxu0 %v317_v0  ;;  %v240_v9 = vld [vmem:[#allocation2] sm:$0xff]   ;;  %s285_s13 = scalar_lea.vmem %s172_s12, 256  ;;  %p290_p3 = scmp.lt.s32.totalorder %s172_s12, %s172_s12 }
  0x2a   :  { %v184_v10 = vld [vmem:[%s383_s2] ss:$0 sm:$0xff]  ;;  %p286_p2 = scmp.ne.s32.totalorder %s172_s12, %s285_s13  ;;  %p291_p4 = scmp.lt.s32.totalorder %s285_s13, %s285_s13 }
  0x2c   :  { %p292_p5 = por %p291_p4, %p290_p3 }
  0x2e   :  { %p293_p6 = pnand %p292_p5, %p286_p2 }
  0x30   :  { %206 = vmatpush3.bf16.xpose.msra.mxu0 %v233_v2 }
  0x31   :  { %207 = vmatprep.subr.bf16.mxu0 %v317_v0 }
  0x38   :  { %208 = vmatpush3.bf16.xpose.msra.mxu0 %v234_v3 }
  0x39   :  { %209 = vmatprep.subr.bf16.mxu0 %v317_v0 }
  0x40   :  { %210 = vmatpush3.bf16.xpose.msra.mxu0 %v235_v4 }
  0x41   :  { %211 = vmatprep.subr.bf16.mxu0 %v317_v0 }
  0x48   :  { %212 = vmatpush3.bf16.xpose.msra.mxu0 %v236_v5 }
  0x49   :  { %213 = vmatprep.subr.bf16.mxu0 %v317_v0 }
  0x50   :  { %214 = vmatpush3.bf16.xpose.msra.mxu0 %v237_v6 }
  0x51   :  { %215 = vmatprep.subr.bf16.mxu0 %v317_v0 }
  0x58   :  { %216 = vmatpush3.bf16.xpose.msra.mxu0 %v238_v7 }
  0x59   :  { %217 = vmatprep.subr.bf16.mxu0 %v317_v0 }
  0x60   :  { %218 = vmatpush3.bf16.xpose.msra.mxu0 %v239_v8 }
  0x67   :  { %220 = vmatmul.mubr.bf16.vlgmr.msra.gmra.mrb[0].mxu0 %v240_v9 }
 0x13a   :  { %v157_v11 = vpop.f32.mrb[0].mxu0 }
 0x13b   :  { %v158_v12 = vadd.f32 %v184_v10, %v157_v11  ;;  %v221_v13 = vpop.f32.mrb[1].mxu0 }
 0x13c   :  { %v160_v14 = vpop.f32.mrb[2].mxu0 }
 0x13d   :  { %164 = vst [vmem:[#allocation7] sm:$0xff] %v158_v12  ;;  %v161_v15 = vadd.f32 %v184_v10, %v160_v14  ;;  %v222_v16 = vpop.f32.mrb[3].mxu0 }
 0x13f   :  { %165 = vst [vmem:[#allocation7 + $0x8] sm:$0xff] %v161_v15 }
 0x140   :  { %296 = shalt.err (!%p293_p6)
}
 0x141   :  { %s297_s15 = scalar_lea.hbm %s384_s3, 256 }
 0x142   :  { %p298_p7 = scmp.ne.s32.totalorder %s384_s3, %s297_s15  ;;  %p301_p8 = scmp.lt.u32.totalorder %s297_s15, %s384_s3 }
 0x144   :  { %p303_p9 = pnand %p301_p8, %p298_p7 }
 0x146   :  { %306 = shalt.err (!%p303_p9)
}
 0x147   :  { %s320_s20 = smov 128   ;;  %s321_s21 = smov 8  }
 0x148   :  { %177 = dma.vmem_to_hbm [thread:$0]  %s172_s12, 256, %s384_s3, [#allocation4], %s320_s20, %s320_s20, %s321_s21  }
 0x149   :  { %311 = dma.done.wait [#allocation4], 256  }
 0x14a   :  { %312 = vsyncadd [#allocation4], 4294967040 }
 0x14b   :  { %181 = vsyncpa [#allocation3], 1 }
 0x14c   :  { %182 = vsyncpa [#allocation6], 1 }
 0x14d   :  { %183 = vsyncpa [#allocation4], 1 }

</bundles_post_ra>
